<compile_context>
chip_gen: v6e
topology: v6e:2x2x1
jax: 0.10.0
libtpu: 0.0.40
codegen_flags: <defaults>
</compile_context>

<pallas_src>
import functools

import jax
import jax.numpy as jnp
from jax.experimental import pallas as pl
from jax.experimental.pallas import tpu as pltpu

NEG_SLOPE = 0.01       # nn.LeakyReLU default
_MU_MIN = 1e-12        # clamp on outputs[:, 0]
_SIGMA_MIN = 1.0       # clamp on outputs[:, 1]

# dot_general dimension numbers for feature-major compute:
#   layer 1: w (in, n) x x (TB, in)  -> (n, TB)   (contract w dim0 with x dim1)
#   layers 2+: w (m, n) x h (m, TB)  -> (n, TB)   (contract dim0 with dim0)
_DN_X = (((0,), (1,)), ((), ()))
_DN_H = (((0,), (0,)), ((), ()))


def _leaky_relu(v):
    return jnp.where(v >= 0, v, NEG_SLOPE * v)


def ndnn_kernel(x_ref,
                w1_ref, b1_ref,
                w2_ref, b2_ref,
                w3_ref, b3_ref,
                w4_ref, b4_ref,
                out_ref):
    """One batch tile (TB rows); writes a lane-dense (2, TB) output block."""
    wdt = w1_ref.dtype  # matmul operand dtype (f32 or bf16)

    x = x_ref[...]                                                 # (TB, in)
    h = jax.lax.dot_general(w1_ref[...], x, dimension_numbers=_DN_X,
                            preferred_element_type=jnp.float32)    # (40, TB)
    h = _leaky_relu(h + b1_ref[...])

    h = jax.lax.dot_general(w2_ref[...], h.astype(wdt),
                            dimension_numbers=_DN_H,
                            preferred_element_type=jnp.float32)    # (20, TB)
    h = _leaky_relu(h + b2_ref[...])

    h = jax.lax.dot_general(w3_ref[...], h.astype(wdt),
                            dimension_numbers=_DN_H,
                            preferred_element_type=jnp.float32)    # (10, TB)
    h = _leaky_relu(h + b3_ref[...])

    y = jax.lax.dot_general(w4_ref[...], h.astype(wdt),
                            dimension_numbers=_DN_H,
                            preferred_element_type=jnp.float32)    # (2, TB)
    y = y + b4_ref[...]

    # Final nn.ReLU() followed by max(., [1e-12, 1.0]) collapses into a single
    # broadcast maximum: both clamp constants are >= 0, so
    # max(max(y, 0), c) == max(y, c).  Clamp built from an in-kernel iota
    # (row 0 -> mu clamp, row 1 -> sigma clamp) to avoid captured constants.
    row = jax.lax.broadcasted_iota(jnp.int32, y.shape, 0)
    clamp = jnp.where(row == 0, _MU_MIN, _SIGMA_MIN)
    out_ref[...] = jnp.maximum(y, clamp)


def _round_up(n, m):
    return ((n + m - 1) // m) * m


@functools.partial(jax.jit, static_argnames=("block_batch", "use_bf16"))
def normal_distribution_nn_forward(x, params, *, block_batch=8192,
                                   use_bf16=False):
    """Returns (loc, scale), each shape (batch,), float32."""
    (w1, b1), (w2, b2), (w3, b3), (w4, b4) = params
    B, in_features = x.shape

    compute_dtype = jnp.bfloat16 if use_bf16 else jnp.float32
    x = x.astype(compute_dtype)
    w1, w2, w3, w4 = (w.astype(compute_dtype) for w in (w1, w2, w3, w4))
    # Feature-major biases: (n, 1) so they broadcast along the batch lanes.
    b1, b2, b3, b4 = (b.reshape(-1, 1).astype(jnp.float32)
                      for b in (b1, b2, b3, b4))

    # Batch tile: multiple of 128 (batch is the lane axis of every activation
    # and of the output slab).  Big tiles amortize per-step overhead; tiny
    # batches are only padded up to one 128-row tile.
    tb = min(block_batch, _round_up(B, 128))
    # Ensure >= 2 grid steps for large B so the "parallel" axis can shard
    # across both TensorCores on v7x (no-op on v5e/v6e).
    if B >= 256:
        tb = min(tb, _round_up((B + 1) // 2, 128))
    tb = max(128, _round_up(tb, 128))

    # Per-row VMEM budget (double-buffered x block + f32 intermediates +
    # double-buffered output block); cap tb so a tile stays well under the
    # scoped limit on every generation (v7x: 64 MiB physical).
    hidden = [int(w.shape[1]) for w in (w1, w2, w3, w4)]
    row_bytes = (2 * max(in_features, 128) * x.dtype.itemsize   # x, 2 buffers
                 + 4 * sum(max(h, 8) for h in hidden)           # intermediates
                 + 2 * 8 * 4)                                   # out, 2 buffers
    vmem_budget = 24 * 1024 * 1024
    tb_cap = max(128, (vmem_budget // row_bytes) // 128 * 128)
    tb = min(tb, tb_cap)

    b_pad = _round_up(B, tb)
    if b_pad != B:
        # Padded rows flow through the MLP (biases make them nonzero) but are
        # sliced off below and never escape.
        x = jnp.pad(x, ((0, b_pad - B), (0, 0)))
    grid = (b_pad // tb,)

    def _const_spec(shape):
        # Full-array block, same block index every grid step -> VMEM-resident.
        return pl.BlockSpec(shape, lambda i: (0,) * len(shape))

    in_specs = [
        pl.BlockSpec((tb, in_features), lambda i: (i, 0)),
        _const_spec(w1.shape), _const_spec(b1.shape),
        _const_spec(w2.shape), _const_spec(b2.shape),
        _const_spec(w3.shape), _const_spec(b3.shape),
        _const_spec(w4.shape), _const_spec(b4.shape),
    ]
    # Lane-dense output slab: (2, b_pad), blocked (2, tb).
    out_specs = pl.BlockSpec((2, tb), lambda i: (0, i))
    out_shape = jax.ShapeDtypeStruct((2, b_pad), jnp.float32)

    # Advisory cost hint for XLA scheduling.
    flops = 2 * b_pad * sum(int(w.shape[0]) * int(w.shape[1])
                            for w in (w1, w2, w3, w4))
    param_bytes = sum(int(a.size) * a.dtype.itemsize
                      for a in (w1, b1, w2, b2, w3, b3, w4, b4))
    bytes_accessed = (b_pad * (in_features * x.dtype.itemsize + 2 * 4)
                      + param_bytes)

    out = pl.pallas_call(
        ndnn_kernel,
        out_shape=out_shape,
        grid=grid,
        in_specs=in_specs,
        out_specs=out_specs,
        compiler_params=pltpu.CompilerParams(
            dimension_semantics=("parallel",),
            vmem_limit_bytes=48 * 1024 * 1024),
        cost_estimate=pl.CostEstimate(
            flops=flops, transcendentals=0, bytes_accessed=bytes_accessed),
    )(x, w1, b1, w2, b2, w3, b3, w4, b4)

    return out[0, :B], out[1, :B]


def init_params(key, input_size, neurons_per_layer=(40, 20, 10), output_size=2):
    """Deterministic init mimicking torch.nn.Linear (uniform +/-1/sqrt(fan_in)).

    Weights are stored as (in_features, out_features); biases as (out,)."""
    sizes = [input_size, *neurons_per_layer, output_size]
    params = []
    for i in range(len(sizes) - 1):
        fan_in, fan_out = sizes[i], sizes[i + 1]
        key, kw, kb = jax.random.split(key, 3)
        bound = 1.0 / jnp.sqrt(fan_in)
        w = jax.random.uniform(kw, (fan_in, fan_out), jnp.float32, -bound, bound)
        b = jax.random.uniform(kb, (fan_out,), jnp.float32, -bound, bound)
        params.append((w, b))
    return tuple(params)


def _reference_forward(x, params):
    """Pure-JAX reference for sanity checking."""
    h = x
    for (w, b) in params[:-1]:
        h = h @ w + b
        h = jnp.where(h >= 0, h, NEG_SLOPE * h)
    w, b = params[-1]
    y = jnp.maximum(h @ w + b, 0.0)
    return jnp.maximum(y[:, 0], _MU_MIN), jnp.maximum(y[:, 1], _SIGMA_MIN)


if __name__ == "__main__":
    key = jax.random.PRNGKey(0)
    kx, kp, kx2 = jax.random.split(key, 3)

    input_size = 16
    params = init_params(kp, input_size)

    # Small batch: single tile (padded up to 128 rows internally).
    batch = 8
    x = jax.random.normal(kx, (batch, input_size), jnp.float32)
    loc, scale = normal_distribution_nn_forward(x, params)
    jax.block_until_ready((loc, scale))
    ref_loc, ref_scale = _reference_forward(x, params)
    assert loc.shape == (batch,) and scale.shape == (batch,)
    assert jnp.allclose(loc, ref_loc, atol=1e-5, rtol=1e-5)
    assert jnp.allclose(scale, ref_scale, atol=1e-5, rtol=1e-5)

    # Larger batch: exercises multi-step batch grid + remainder padding.
    batch2 = 300
    x2 = jax.random.normal(kx2, (batch2, input_size), jnp.float32)
    loc2, scale2 = normal_distribution_nn_forward(x2, params, block_batch=128)
    jax.block_until_ready((loc2, scale2))
    ref_loc2, ref_scale2 = _reference_forward(x2, params)
    assert loc2.shape == (batch2,) and scale2.shape == (batch2,)
    assert jnp.allclose(loc2, ref_loc2, atol=1e-5, rtol=1e-5)
    assert jnp.allclose(scale2, ref_scale2, atol=1e-5, rtol=1e-5)

    # Optional bf16 fast path: f32 MXU accumulation, bf16 operands.  Deviates
    # slightly from the f32 reference -> loose tolerance plus clamp checks.
    loc_bf, scale_bf = normal_distribution_nn_forward(
        x2, params, block_batch=128, use_bf16=True)
    jax.block_until_ready((loc_bf, scale_bf))
    assert jnp.all(jnp.isfinite(loc_bf)) and jnp.all(jnp.isfinite(scale_bf))
    assert jnp.all(scale_bf >= _SIGMA_MIN) and jnp.all(loc_bf >= _MU_MIN)
    assert jnp.allclose(loc_bf, ref_loc2, atol=5e-2, rtol=5e-2)
    assert jnp.allclose(scale_bf, ref_scale2, atol=5e-2, rtol=5e-2)

    # TODO(synk): torch.distributions.Normal object itself (log_prob/cdf
    # helpers) has no Pallas equivalent; the kernel returns its (loc, scale).
    print("KERNEL_OK")
</pallas_src>

<mosaic_0001>
module attributes {stable_mosaic.version = 11 : i64} {
  func.func @ndnn_kernel(%arg0: i32, %arg1: memref<128x16xf32, #tpu.memory_space<vmem>>, %arg2: memref<16x40xf32, #tpu.memory_space<vmem>>, %arg3: memref<40x1xf32, #tpu.memory_space<vmem>>, %arg4: memref<40x20xf32, #tpu.memory_space<vmem>>, %arg5: memref<20x1xf32, #tpu.memory_space<vmem>>, %arg6: memref<20x10xf32, #tpu.memory_space<vmem>>, %arg7: memref<10x1xf32, #tpu.memory_space<vmem>>, %arg8: memref<10x2xf32, #tpu.memory_space<vmem>>, %arg9: memref<2x1xf32, #tpu.memory_space<vmem>>, %arg10: memref<2x128xf32, #tpu.memory_space<vmem>>) attributes {dimension_semantics = [#tpu.dimension_semantics<parallel>], iteration_bounds = array<i64: 1>, scalar_prefetch = 0 : i64, scratch_operands = 0 : i64, tpu.core_type = #tpu.core_type<tc>, window_params = [{transform_indices = @transform_0, window_bounds = array<i64: 128, 16>}, {pipeline_mode = #tpu.pipeline_mode<synchronous>, transform_indices = @transform_1, window_bounds = array<i64: 16, 40>}, {pipeline_mode = #tpu.pipeline_mode<synchronous>, transform_indices = @transform_2, window_bounds = array<i64: 40, 1>}, {pipeline_mode = #tpu.pipeline_mode<synchronous>, transform_indices = @transform_3, window_bounds = array<i64: 40, 20>}, {pipeline_mode = #tpu.pipeline_mode<synchronous>, transform_indices = @transform_4, window_bounds = array<i64: 20, 1>}, {pipeline_mode = #tpu.pipeline_mode<synchronous>, transform_indices = @transform_5, window_bounds = array<i64: 20, 10>}, {pipeline_mode = #tpu.pipeline_mode<synchronous>, transform_indices = @transform_6, window_bounds = array<i64: 10, 1>}, {pipeline_mode = #tpu.pipeline_mode<synchronous>, transform_indices = @transform_7, window_bounds = array<i64: 10, 2>}, {pipeline_mode = #tpu.pipeline_mode<synchronous>, transform_indices = @transform_8, window_bounds = array<i64: 2, 1>}, {transform_indices = @transform_9, window_bounds = array<i64: 2, 128>}]} {
    %c0 = arith.constant 0 : index
    %c0_0 = arith.constant 0 : index
    %0 = vector.load %arg1[%c0, %c0_0] : memref<128x16xf32, #tpu.memory_space<vmem>>, vector<128x16xf32>
    %c0_1 = arith.constant 0 : index
    %c0_2 = arith.constant 0 : index
    %1 = vector.load %arg2[%c0_1, %c0_2] : memref<16x40xf32, #tpu.memory_space<vmem>>, vector<16x40xf32>
    %cst = arith.constant dense<0.000000e+00> : vector<40x128xf32>
    %2 = tpu.matmul %1, %0, %cst {dimension_numbers = #tpu.dot_dimension_numbers<[0], [1], [1], [0], [0, 1, 1, 0], [], []>} : vector<16x40xf32>, vector<128x16xf32>, vector<40x128xf32> -> vector<40x128xf32>
    %c0_3 = arith.constant 0 : index
    %c0_4 = arith.constant 0 : index
    %3 = vector.load %arg3[%c0_3, %c0_4] : memref<40x1xf32, #tpu.memory_space<vmem>>, vector<40x1xf32>
    %4 = vector.broadcast %3 : vector<40x1xf32> to vector<40x128xf32>
    %5 = arith.addf %2, %4 : vector<40x128xf32>
    %cst_5 = arith.constant 0.000000e+00 : f32
    %6 = vector.broadcast %cst_5 : f32 to vector<40x128xf32>
    %7 = arith.cmpf oge, %5, %6 : vector<40x128xf32>
    %cst_6 = arith.constant 0.00999999977 : f32
    %8 = vector.broadcast %cst_6 : f32 to vector<40x128xf32>
    %9 = arith.mulf %8, %5 : vector<40x128xf32>
    %10 = arith.select %7, %5, %9 : vector<40x128xi1>, vector<40x128xf32>
    %c0_7 = arith.constant 0 : index
    %c0_8 = arith.constant 0 : index
    %11 = vector.load %arg4[%c0_7, %c0_8] : memref<40x20xf32, #tpu.memory_space<vmem>>, vector<40x20xf32>
    %cst_9 = arith.constant dense<0.000000e+00> : vector<20x128xf32>
    %12 = tpu.matmul %11, %10, %cst_9 {dimension_numbers = #tpu.dot_dimension_numbers<[0], [0], [1], [1], [0, 1, 1, 1], [], []>} : vector<40x20xf32>, vector<40x128xf32>, vector<20x128xf32> -> vector<20x128xf32>
    %c0_10 = arith.constant 0 : index
    %c0_11 = arith.constant 0 : index
    %13 = vector.load %arg5[%c0_10, %c0_11] : memref<20x1xf32, #tpu.memory_space<vmem>>, vector<20x1xf32>
    %14 = vector.broadcast %13 : vector<20x1xf32> to vector<20x128xf32>
    %15 = arith.addf %12, %14 : vector<20x128xf32>
    %cst_12 = arith.constant 0.000000e+00 : f32
    %16 = vector.broadcast %cst_12 : f32 to vector<20x128xf32>
    %17 = arith.cmpf oge, %15, %16 : vector<20x128xf32>
    %cst_13 = arith.constant 0.00999999977 : f32
    %18 = vector.broadcast %cst_13 : f32 to vector<20x128xf32>
    %19 = arith.mulf %18, %15 : vector<20x128xf32>
    %20 = arith.select %17, %15, %19 : vector<20x128xi1>, vector<20x128xf32>
    %c0_14 = arith.constant 0 : index
    %c0_15 = arith.constant 0 : index
    %21 = vector.load %arg6[%c0_14, %c0_15] : memref<20x10xf32, #tpu.memory_space<vmem>>, vector<20x10xf32>
    %cst_16 = arith.constant dense<0.000000e+00> : vector<10x128xf32>
    %22 = tpu.matmul %21, %20, %cst_16 {dimension_numbers = #tpu.dot_dimension_numbers<[0], [0], [1], [1], [0, 1, 1, 1], [], []>} : vector<20x10xf32>, vector<20x128xf32>, vector<10x128xf32> -> vector<10x128xf32>
    %c0_17 = arith.constant 0 : index
    %c0_18 = arith.constant 0 : index
    %23 = vector.load %arg7[%c0_17, %c0_18] : memref<10x1xf32, #tpu.memory_space<vmem>>, vector<10x1xf32>
    %24 = vector.broadcast %23 : vector<10x1xf32> to vector<10x128xf32>
    %25 = arith.addf %22, %24 : vector<10x128xf32>
    %cst_19 = arith.constant 0.000000e+00 : f32
    %26 = vector.broadcast %cst_19 : f32 to vector<10x128xf32>
    %27 = arith.cmpf oge, %25, %26 : vector<10x128xf32>
    %cst_20 = arith.constant 0.00999999977 : f32
    %28 = vector.broadcast %cst_20 : f32 to vector<10x128xf32>
    %29 = arith.mulf %28, %25 : vector<10x128xf32>
    %30 = arith.select %27, %25, %29 : vector<10x128xi1>, vector<10x128xf32>
    %c0_21 = arith.constant 0 : index
    %c0_22 = arith.constant 0 : index
    %31 = vector.load %arg8[%c0_21, %c0_22] : memref<10x2xf32, #tpu.memory_space<vmem>>, vector<10x2xf32>
    %cst_23 = arith.constant dense<0.000000e+00> : vector<2x128xf32>
    %32 = tpu.matmul %31, %30, %cst_23 {dimension_numbers = #tpu.dot_dimension_numbers<[0], [0], [1], [1], [0, 1, 1, 1], [], []>} : vector<10x2xf32>, vector<10x128xf32>, vector<2x128xf32> -> vector<2x128xf32>
    %c0_24 = arith.constant 0 : index
    %c0_25 = arith.constant 0 : index
    %33 = vector.load %arg9[%c0_24, %c0_25] : memref<2x1xf32, #tpu.memory_space<vmem>>, vector<2x1xf32>
    %34 = vector.broadcast %33 : vector<2x1xf32> to vector<2x128xf32>
    %35 = arith.addf %32, %34 : vector<2x128xf32>
    %36 = tpu.iota {dimensions = array<i32: 0>} : vector<2x128xi32>
    %c0_i32 = arith.constant 0 : i32
    %37 = vector.broadcast %c0_i32 : i32 to vector<2x128xi32>
    %38 = arith.cmpi eq, %36, %37 : vector<2x128xi32>
    %cst_26 = arith.constant 9.99999996E-13 : f32
    %cst_27 = arith.constant 1.000000e+00 : f32
    %39 = vector.broadcast %cst_26 : f32 to vector<2x128xf32>
    %40 = vector.broadcast %cst_27 : f32 to vector<2x128xf32>
    %41 = arith.select %38, %39, %40 : vector<2x128xi1>, vector<2x128xf32>
    %42 = arith.maximumf %35, %41 : vector<2x128xf32>
    %c0_28 = arith.constant 0 : index
    %c0_29 = arith.constant 0 : index
    %43 = vector.load %arg10[%c0_28, %c0_29] : memref<2x128xf32, #tpu.memory_space<vmem>>, vector<2x128xf32>
    tpu.vector_store %arg10[%c0_28, %c0_29], %42 {strides = array<i32>} : memref<2x128xf32, #tpu.memory_space<vmem>>, vector<2x128xf32>,
    return
  }
  func.func @transform_0(%arg0: i32) -> (i32, i32) {
    %c0_i32 = arith.constant 0 : i32
    %c0_i32_0 = arith.constant 0 : i32
    return %arg0, %c0_i32 : i32, i32
  }
  func.func @transform_1(%arg0: i32) -> (i32, i32) {
    %c0_i32 = arith.constant 0 : i32
    %c0_i32_0 = arith.constant 0 : i32
    %c0_i32_1 = arith.constant 0 : i32
    return %c0_i32, %c0_i32_0 : i32, i32
  }
  func.func @transform_2(%arg0: i32) -> (i32, i32) {
    %c0_i32 = arith.constant 0 : i32
    %c0_i32_0 = arith.constant 0 : i32
    %c0_i32_1 = arith.constant 0 : i32
    return %c0_i32, %c0_i32_0 : i32, i32
  }
  func.func @transform_3(%arg0: i32) -> (i32, i32) {
    %c0_i32 = arith.constant 0 : i32
    %c0_i32_0 = arith.constant 0 : i32
    %c0_i32_1 = arith.constant 0 : i32
    return %c0_i32, %c0_i32_0 : i32, i32
  }
  func.func @transform_4(%arg0: i32) -> (i32, i32) {
    %c0_i32 = arith.constant 0 : i32
    %c0_i32_0 = arith.constant 0 : i32
    %c0_i32_1 = arith.constant 0 : i32
    return %c0_i32, %c0_i32_0 : i32, i32
  }
  func.func @transform_5(%arg0: i32) -> (i32, i32) {
    %c0_i32 = arith.constant 0 : i32
    %c0_i32_0 = arith.constant 0 : i32
    %c0_i32_1 = arith.constant 0 : i32
    return %c0_i32, %c0_i32_0 : i32, i32
  }
  func.func @transform_6(%arg0: i32) -> (i32, i32) {
    %c0_i32 = arith.constant 0 : i32
    %c0_i32_0 = arith.constant 0 : i32
    %c0_i32_1 = arith.constant 0 : i32
    return %c0_i32, %c0_i32_0 : i32, i32
  }
  func.func @transform_7(%arg0: i32) -> (i32, i32) {
    %c0_i32 = arith.constant 0 : i32
    %c0_i32_0 = arith.constant 0 : i32
    %c0_i32_1 = arith.constant 0 : i32
    return %c0_i32, %c0_i32_0 : i32, i32
  }
  func.func @transform_8(%arg0: i32) -> (i32, i32) {
    %c0_i32 = arith.constant 0 : i32
    %c0_i32_0 = arith.constant 0 : i32
    %c0_i32_1 = arith.constant 0 : i32
    return %c0_i32, %c0_i32_0 : i32, i32
  }
  func.func @transform_9(%arg0: i32) -> (i32, i32) {
    %c0_i32 = arith.constant 0 : i32
    %c0_i32_0 = arith.constant 0 : i32
    return %c0_i32, %arg0 : i32, i32
  }
}

</mosaic_0001>

<bundles_post_ra>
// kernel: normal_distribution_nn_forward.1
= control target key start
LH: loop header
LB: loop body
LE: loop exit
PB: predicated region body
PF: predicated region fallthrough
CT: control target
= control target key end

     0   :  { %vm112_vm0 = vcmask 130048   ;;  %v856_v1 = vmov 0.0   ;;  %v857_v3 = vmov 0   ;;  %vm858_vm1 = vmmov 0   ;;  %s1094_s1 = inlined_call_operand.vmem [shape: f32[16,40], index: 1, kind: input, shape index: {}]   ;;  %s1095_s0 = inlined_call_operand.vmem [shape: f32[128,16], index: 0, kind: input, shape index: {}]   ;;  %s1096_s2 = inlined_call_operand.vmem [shape: f32[40,1], index: 2, kind: input, shape index: {}]   ;;  %s1097_s3 = inlined_call_operand.vmem [shape: f32[40,20], index: 3, kind: input, shape index: {}]   ;;  %s1098_s4 = inlined_call_operand.vmem [shape: f32[20,1], index: 4, kind: input, shape index: {}]   ;;  %s1099_s5 = inlined_call_operand.vmem [shape: f32[20,10], index: 5, kind: input, shape index: {}]   ;;  %s1100_s6 = inlined_call_operand.vmem [shape: f32[10,1], index: 6, kind: input, shape index: {}]   ;;  %s1101_s8 = inlined_call_operand.vmem [shape: f32[2,1], index: 8, kind: input, shape index: {}]   ;;  %s1102_s7 = inlined_call_operand.vmem [shape: f32[10,2], index: 7, kind: input, shape index: {}]   ;;  %s1103_s9 = inlined_call_operand.vmem [shape: f32[2,128], index: 9, kind: output, shape index: {}]  }
   0x1   :  { %v48_v0 = vld [vmem:[%s1094_s1] sm:$0xff]  ;;  %768 = vmatprep.subr.mxu0 %v856_v1  ;;  %v47_v2 = vld [vmem:[%s1095_s0 + $0x78] sm:$0xff]  ;;  %854 = vset.pattern.permute.xlu1 %v857_v3  ;;  %v49_v5 = vld [vmem:[%s1094_s1 + $0x8] sm:$0xff]  ;;  %vm336_vm7 = vcmask 326656   ;;  %vm482_vm8 = vcmask 162816   ;;  %vm489_vm10 = vcmask 1043456  }
   0x2   :  { %80 = vxpose.xlu0.b32.start [1/2] (short) (narrow) %v48_v0, 40  ;;  %769 = vmatpush3.xpose.msk.msra.mxu0 %vm112_vm0, %v47_v2  ;;  %v54_v4 = vld [vmem:[%s1096_s2 + $0x20] sm:$0xff]  ;;  %v46_v6 = vld [vmem:[%s1095_s0 + $0x70] sm:$0xff]  ;;  %v53_v7 = vld [vmem:[%s1096_s2 + $0x18] sm:$0xff]  ;;  %vm618_vm14 = vcmask 1041408  }
   0x3   :  { %770 = vmatprep.subr.mxu0 %v856_v1  ;;  %77 = vperm.xlu1 %854, %v54_v4   ;;  %v45_v8 = vld [vmem:[%s1095_s0 + $0x68] sm:$0xff]  ;;  %v44_v10 = vld [vmem:[%s1095_s0 + $0x60] sm:$0xff]  ;;  %v43_v12 = vld [vmem:[%s1095_s0 + $0x58] sm:$0xff] }
   0x4   :  { %800 = vmatprep.mubr.msk.f32.mxu0 %vm858_vm1, %v856_v1  ;;  %815 = vmatprep.subr.mxu1 %v856_v1  ;;  %v51_v9 = vld [vmem:[%s1096_s2 + $0x8] sm:$0xff]  ;;  %v50_v11 = vld [vmem:[%s1096_s2] sm:$0xff]  ;;  %v42_v13 = vld [vmem:[%s1095_s0 + $0x50] sm:$0xff] }
   0x5   :  { %825 = vmatprep.mubr.msk.f32.mxu1 %vm858_vm1, %v856_v1  ;;  %v41_v14 = vld [vmem:[%s1095_s0 + $0x48] sm:$0xff]  ;;  %v40_v15 = vld [vmem:[%s1095_s0 + $0x40] sm:$0xff]  ;;  %v39_v16 = vld [vmem:[%s1095_s0 + $0x38] sm:$0xff] }
   0x6   :  { %81 = vxpose.xlu0.b32.end [2/2] (short) (narrow) %v49_v5, 40  ;;  %771 = vmatpush3.xpose.msk.msra.mxu0 %vm112_vm0, %v46_v6  ;;  %v38_v17 = vld [vmem:[%s1095_s0 + $0x30] sm:$0xff]  ;;  %v37_v18 = vld [vmem:[%s1095_s0 + $0x28] sm:$0xff]  ;;  %v36_v19 = vld [vmem:[%s1095_s0 + $0x20] sm:$0xff] }
   0x7   :  { %772 = vmatprep.subr.mxu0 %v856_v1  ;;  %72 = vperm.xlu1 %854, %v53_v7   ;;  %v35_v20 = vld [vmem:[%s1095_s0 + $0x18] sm:$0xff]  ;;  %v34_v21 = vld [vmem:[%s1095_s0 + $0x10] sm:$0xff]  ;;  %v281_v22 = vld [vmem:[%s1097_s3] sm:$0xff] }
   0x8   :  { %v33_v23 = vld [vmem:[%s1095_s0 + $0x8] sm:$0xff]  ;;  %v52_v24 = vld [vmem:[%s1096_s2 + $0x10] sm:$0xff]  ;;  %v32_v26 = vld [vmem:[%s1095_s0] sm:$0xff] }
   0x9   :  { %v282_v25 = vld [vmem:[%s1097_s3 + $0x8] sm:$0xff]  ;;  %v288_v27 = vld [vmem:[%s1098_s4 + $0x10] sm:$0xf]  ;;  %v284_v30 = vld [vmem:[%s1097_s3 + $0x18] sm:$0xff] }
   0xa   :  { %773 = vmatpush3.xpose.msk.msra.mxu0 %vm112_vm0, %v45_v8  ;;  %v283_v28 = vld [vmem:[%s1097_s3 + $0x10] sm:$0xff]  ;;  %v287_v29 = vld [vmem:[%s1098_s4 + $0x8] sm:$0xff]  ;;  %v286_v31 = vld [vmem:[%s1098_s4] sm:$0xff] }
   0xb   :  { %774 = vmatprep.subr.mxu0 %v856_v1  ;;  %62 = vperm.xlu1 %854, %v51_v9   ;;  %v285_v32 = vld [vmem:[%s1097_s3 + $0x20] sm:$0xff]  ;;  %v439_v34 = vld [vmem:[%s1100_s6 + $0x8] sm:$0x3]  ;;  %v437_v37 = vld [vmem:[%s1099_s5 + $0x10] sm:$0xf] }
   0xc   :  { %v435_v33 = vld [vmem:[%s1099_s5] sm:$0xff]  ;;  %v436_v35 = vld [vmem:[%s1099_s5 + $0x8] sm:$0xff] }
   0xd   :  { %v438_v36 = vld [vmem:[%s1100_s6] sm:$0xff] }
   0xe   :  { %775 = vmatpush3.xpose.msk.msra.mxu0 %vm112_vm0, %v44_v10  ;;  %v576_v43 = vld [vmem:[%s1101_s8] sm:$0x3] }
   0xf   :  { %776 = vmatprep.subr.mxu0 %v856_v1  ;;  %57 = vperm.xlu1 %854, %v50_v11  }
  0x12   :  { %777 = vmatpush3.xpose.msk.msra.mxu0 %vm112_vm0, %v43_v12 }
  0x13   :  { %778 = vmatprep.subr.mxu0 %v856_v1 }
  0x16   :  { %779 = vmatpush3.xpose.msk.msra.mxu0 %vm112_vm0, %v42_v13 }
  0x17   :  { %780 = vmatprep.subr.mxu0 %v856_v1 }
  0x1a   :  { %781 = vmatpush3.xpose.msk.msra.mxu0 %vm112_vm0, %v41_v14 }
  0x1b   :  { %782 = vmatprep.subr.mxu0 %v856_v1 }
  0x1e   :  { %783 = vmatpush3.xpose.msk.msra.mxu0 %vm112_vm0, %v40_v15 }
  0x1f   :  { %784 = vmatprep.subr.mxu0 %v856_v1 }
  0x22   :  { %785 = vmatpush3.xpose.msk.msra.mxu0 %vm112_vm0, %v39_v16 }
  0x23   :  { %786 = vmatprep.subr.mxu0 %v856_v1 }
  0x26   :  { %787 = vmatpush3.xpose.msk.msra.mxu0 %vm112_vm0, %v38_v17 }
  0x27   :  { %788 = vmatprep.subr.mxu0 %v856_v1 }
  0x2a   :  { %789 = vmatpush3.xpose.msk.msra.mxu0 %vm112_vm0, %v37_v18  ;;  %v574_v18 = vld [vmem:[%s1102_s7] sm:$0xff] }
  0x2b   :  { %790 = vmatprep.subr.mxu0 %v856_v1 }
  0x2e   :  { %791 = vmatpush3.xpose.msk.msra.mxu0 %vm112_vm0, %v36_v19  ;;  %v575_v19 = vld [vmem:[%s1102_s7 + $0x8] sm:$0x3] }
  0x2f   :  { %792 = vmatprep.subr.mxu0 %v856_v1  ;;  %855 = vset.pattern.permute.xlu0 %v857_v3 }
  0x32   :  { %793 = vmatpush3.xpose.msk.msra.mxu0 %vm112_vm0, %v35_v20 }
  0x33   :  { %794 = vmatprep.subr.mxu0 %v856_v1 }
  0x36   :  { %795 = vmatpush3.xpose.msk.msra.mxu0 %vm112_vm0, %v34_v21 }
  0x37   :  { %796 = vmatprep.subr.mxu0 %v856_v1 }
  0x38   :  { %304 = vxpose.xlu1.b32.start [1/5] (short) (narrow) %v281_v22, 24 }
  0x3a   :  { %797 = vmatpush3.xpose.msk.msra.mxu0 %vm112_vm0, %v33_v23 }
  0x3b   :  { %798 = vmatprep.subr.mxu0 %v856_v1  ;;  %67 = vperm.xlu0 %855, %v52_v24  }
  0x3c   :  { %305 = vxpose.xlu1.b32.cont [2/5] (short) (narrow) %v282_v25, 24 }
  0x3e   :  { %799 = vmatpush3.xpose.msk.msra.mxu0 %vm112_vm0, %v32_v26 }
  0x3f   :  { %301 = vperm.xlu0 %855, %v288_v27  }
  0x40   :  { %306 = vxpose.xlu1.b32.cont [3/5] (short) (narrow) %v283_v28, 24 }
  0x43   :  { %296 = vperm.xlu0 %855, %v287_v29  }
  0x44   :  { %307 = vxpose.xlu1.b32.cont [4/5] (short) (narrow) %v284_v30, 24 }
  0x47   :  { %291 = vperm.xlu0 %855, %v286_v31  }
  0x48   :  { %308 = vxpose.xlu1.b32.end [5/5] (short) (narrow) %v285_v32, 24 }
  0x65   :  { %450 = vxpose.xlu0.b32.start [1/3] (short) (narrow) %v435_v33, 16 }
  0x66   :  { %447 = vperm.xlu1 %854, %v439_v34  }
  0x69   :  { %451 = vxpose.xlu0.b32.cont [2/3] (short) (narrow) %v436_v35, 16 }
  0x6a   :  { %442 = vperm.xlu1 %854, %v438_v36  }
  0x6d   :  { %452 = vxpose.xlu0.b32.end [3/3] (short) (narrow) %v437_v37, 16 }
  0x7e   :  { %v96_v38 = vpop.trf.xlu0  ;;  %v78_v45 = vpop.permute.xlu1 %77 }
  0x7f   :  { %801 = vmatmul.mubr.msk.f32.vlgmr.msra.gmra.mxu0 %vm112_vm0, %v96_v38 }
  0x80   :  { %803 = vmatprep.mubr.msk.f32.mxu0 %vm858_vm1, %v856_v1 }
  0x82   :  { %v97_v39 = vpop.trf.xlu0  ;;  %v73_v49 = vpop.permute.xlu1 %72 }
  0x83   :  { %804 = vmatmul.mubr.msk.f32.gmra.mxu0 %vm112_vm0, %v97_v39 }
  0x84   :  { %806 = vmatprep.mubr.msk.f32.mxu0 %vm858_vm1, %v856_v1 }
  0x86   :  { %v98_v40 = vpop.trf.xlu0  ;;  %v63_v53 = vpop.permute.xlu1 %62 }
  0x87   :  { %807 = vmatmul.mubr.msk.f32.gmra.mxu0 %vm112_vm0, %v98_v40 }
  0x88   :  { %809 = vmatprep.mubr.msk.f32.mxu0 %vm858_vm1, %v856_v1 }
  0x8a   :  { %v99_v41 = vpop.trf.xlu0  ;;  %v58_v0 = vpop.permute.xlu1 %57 }
  0x8b   :  { %810 = vmatmul.mubr.msk.f32.gmra.mxu0 %vm112_vm0, %v99_v41 }
  0x8c   :  { %812 = vmatprep.mubr.msk.f32.mxu0 %vm858_vm1, %v856_v1 }
  0x8e   :  { %v100_v42 = vpop.trf.xlu0 }
  0x8f   :  { %813 = vmatmul.mubr.msk.f32.gmra.mxu0 %vm112_vm0, %v100_v42  ;;  %vm614_vm0 = vcmask 80896  }
  0x93   :  { %582 = vxpose.xlu1.b32.start [1/2] (short) (narrow) %v574_v18, 8 }
  0x96   :  { %579 = vperm.xlu0 %855, %v576_v43  }
  0x97   :  { %583 = vxpose.xlu1.b32.end [2/2] (short) (narrow) %v575_v19, 8 }
  0xb4   :  { %v320_v9 = vpop.trf.xlu1 }
  0xb6   :  { %v68_v56 = vpop.permute.xlu0 %67 }
  0xb8   :  { %v321_v12 = vpop.trf.xlu1 }
  0xba   :  { %v302_v14 = vpop.permute.xlu0 %301 }
  0xbc   :  { %v322_v13 = vpop.trf.xlu1 }
  0xbe   :  { %v297_v15 = vpop.permute.xlu0 %296 }
  0xc2   :  { %v292_v16 = vpop.permute.xlu0 %291 }
  0xe1   :  { %v466_v17 = vpop.trf.xlu0  ;;  %v448_v36 = vpop.permute.xlu1 %447 }
  0xe5   :  { %v467_v35 = vpop.trf.xlu0  ;;  %v443_v39 = vpop.permute.xlu1 %442 }
 0x13f   :  { %v242_v44 = vpop.f32.mrf.mxu0 }
 0x140   :  { %v243_v2 = vadd.f32 %v242_v44, %v58_v0 }
 0x141   :  { %v802_v46 = vpop.f32.mrf.mxu0 }
 0x142   :  { %v271_v7 = vmul.f32 0.01, %v243_v2  ;;  %vm266_vm6 = vcmp.ge.f32.partialorder %v243_v2, 0.0 }
 0x143   :  { %v247_v47 = vpop.f32.mrf.mxu0 }
 0x144   :  { %v248_v61 = vadd.f32 %v247_v47, %v63_v53  ;;  %v276_v11 = vsel %vm266_vm6, %v243_v2, %v271_v7  ;;  %v692_v47 = vlaneseq }
 0x145   :  { %v805_v48 = vpop.f32.mrf.mxu0 }
 0x146   :  { %v272_v5 = vmul.f32 0.01, %v248_v61  ;;  %vm267_vm5 = vcmp.ge.f32.partialorder %v248_v61, 0.0  ;;  %v693_v48 = vshrl.u32 %v692_v47, 7 }
 0x147   :  { %v252_v50 = vpop.f32.mrf.mxu0 }
 0x148   :  { %v253_v58 = vadd.f32 %v252_v50, %v68_v56  ;;  %v277_v10 = vsel %vm267_vm5, %v248_v61, %v272_v5 }
 0x149   :  { %v808_v51 = vpop.f32.mrf.mxu0 }
 0x14a   :  { %v273_v3 = vmul.f32 0.01, %v253_v58  ;;  %vm268_vm4 = vcmp.ge.f32.partialorder %v253_v58, 0.0  ;;  %v859_v51 = vmov 1.0  }
 0x14b   :  { %v257_v52 = vpop.f32.mrf.mxu0 }
 0x14c   :  { %v258_v55 = vadd.f32 %v257_v52, %v73_v49  ;;  %v278_v8 = vsel %vm268_vm4, %v253_v58, %v273_v3  ;;  %v580_v49 = vpop.permute.xlu0 %579 }
 0x14d   :  { %v811_v54 = vpop.f32.mrf.mxu0 }
 0x14e   :  { %v274_v62 = vmul.f32 0.01, %v258_v55  ;;  %vm269_vm3 = vcmp.ge.f32.partialorder %v258_v55, 0.0 }
 0x14f   :  { %v262_v57 = vpop.f32.mrf.mxu0 }
 0x150   :  { %v263_v59 = vadd.f32 %v262_v57, %v78_v45  ;;  %v279_v6 = vsel %vm269_vm3, %v258_v55, %v274_v62  ;;  %v598_v45 = vpop.trf.xlu1 }
 0x151   :  { %v814_v60 = vpop.f32.mrf.mxu0 }
 0x152   :  { %vm270_vm2 = vcmp.ge.f32.partialorder %v263_v59, 0.0  ;;  %v275_v63 = vmul.f32 0.01, %v263_v59 }
 0x154   :  { %v280_v4 = vsel %vm270_vm2, %v263_v59, %v275_v63 }
 0x155   :  { %816 = vmatpush3.msra.mxu1 %v280_v4 }
 0x156   :  { %817 = vmatprep.subr.mxu1 %v856_v1 }
 0x157   :  { %818 = vmatpush3.msra.mxu1 %v279_v6 }
 0x158   :  { %819 = vmatprep.subr.mxu1 %v856_v1 }
 0x159   :  { %820 = vmatpush3.msra.mxu1 %v278_v8 }
 0x15a   :  { %821 = vmatprep.subr.mxu1 %v856_v1 }
 0x15b   :  { %822 = vmatpush3.msra.mxu1 %v277_v10 }
 0x15c   :  { %823 = vmatprep.subr.mxu1 %v856_v1 }
 0x15d   :  { %824 = vmatpush3.msra.mxu1 %v276_v11 }
 0x15e   :  { %826 = vmatmul.mubr.msk.f32.vlgmr.msra.gmra.mxu1 %vm336_vm7, %v320_v9 }
 0x15f   :  { %828 = vmatprep.mubr.msk.f32.mxu1 %vm858_vm1, %v856_v1 }
 0x162   :  { %829 = vmatmul.mubr.msk.f32.gmra.mxu1 %vm336_vm7, %v321_v12 }
 0x163   :  { %831 = vmatprep.mubr.msk.f32.mxu1 %vm858_vm1, %v856_v1 }
 0x166   :  { %832 = vmatmul.mubr.msk.f32.gmra.mxu1 %vm336_vm7, %v322_v13 }
 0x167   :  { %840 = vmatprep.mubr.msk.f32.mxu1 %vm482_vm8, %v466_v17 }
 0x21e   :  { %v412_v20 = vpop.f32.mrf.mxu1 }
 0x21f   :  { %v413_v26 = vadd.f32 %v412_v20, %v292_v16 }
 0x220   :  { %v827_v21 = vpop.f32.mrf.mxu1 }
 0x221   :  { %v429_v31 = vmul.f32 0.01, %v413_v26  ;;  %vm426_vm12 = vcmp.ge.f32.partialorder %v413_v26, 0.0 }
 0x222   :  { %v417_v22 = vpop.f32.mrf.mxu1 }
 0x223   :  { %v418_v24 = vadd.f32 %v417_v22, %v297_v15  ;;  %v432_v34 = vsel %vm426_vm12, %v413_v26, %v429_v31 }
 0x224   :  { %v830_v23 = vpop.f32.mrf.mxu1 }
 0x225   :  { %v430_v29 = vmul.f32 0.01, %v418_v24  ;;  %vm427_vm11 = vcmp.ge.f32.partialorder %v418_v24, 0.0 }
 0x226   :  { %v422_v25 = vpop.f32.mrf.mxu1 }
 0x227   :  { %v423_v27 = vadd.f32 %v422_v25, %v302_v14  ;;  %v433_v33 = vsel %vm427_vm11, %v418_v24, %v430_v29 }
 0x228   :  { %v833_v28 = vpop.f32.mrf.mxu1 }
 0x229   :  { %vm428_vm9 = vcmp.ge.f32.partialorder %v423_v27, 0.0  ;;  %v431_v30 = vmul.f32 0.01, %v423_v27 }
 0x22b   :  { %v434_v32 = vsel %vm428_vm9, %v423_v27, %v431_v30 }
 0x22c   :  { %834 = vmatprep.subr.msk.mxu1 %vm489_vm10, %v434_v32 }
 0x22d   :  { %835 = vmatpush3.msk.msra.mxu1 %vm489_vm10, %v434_v32 }
 0x22e   :  { %836 = vmatprep.subr.mxu1 %v433_v33 }
 0x22f   :  { %837 = vmatpush3.msra.mxu1 %v433_v33 }
 0x230   :  { %838 = vmatprep.subr.mxu1 %v432_v34 }
 0x231   :  { %839 = vmatpush3.msra.mxu1 %v432_v34 }
 0x232   :  { %841 = vmatmul.mubr.msk.f32.vlgmr.msra.gmra.mxu1 %vm482_vm8, %v467_v35  ;;  %843 = vmatprep.subr.mxu1 %v856_v1 }
 0x233   :  { %847 = vmatprep.mubr.msk.f32.mxu1 %vm858_vm1, %v856_v1  ;;  %vm694_vm1 = vcmp.eq.s32.totalorder %v693_v48, 0 }
 0x234   :  { %v695_v52 = vsel %vm694_vm1, 1e-12, %v859_v51 }
 0x2f2   :  { %v842_v37 = vpop.f32.mrf.mxu1 }
 0x2f3   :  { %v565_v38 = vadd.f32 %v842_v37, %v448_v36 }
 0x2f4   :  { %v559_v40 = vpop.f32.mrf.mxu1 }
 0x2f5   :  { %vm569_vm13 = vcmp.ge.f32.partialorder %v565_v38, 0.0  ;;  %v571_v41 = vmul.f32 0.01, %v565_v38  ;;  %v560_v42 = vadd.f32 %v559_v40, %v443_v39 }
 0x2f7   :  { %v573_v43 = vsel %vm569_vm13, %v565_v38, %v571_v41  ;;  %vm568_vm15 = vcmp.ge.f32.partialorder %v560_v42, 0.0  ;;  %v570_v44 = vmul.f32 0.01, %v560_v42 }
 0x2f8   :  { %844 = vmatpush3.msk.msra.mxu1 %vm618_vm14, %v573_v43 }
 0x2f9   :  { %845 = vmatprep.subr.mxu1 %v856_v1  ;;  %v572_v46 = vsel %vm568_vm15, %v560_v42, %v570_v44 }
 0x2fa   :  { %846 = vmatpush3.msra.mxu1 %v572_v46 }
 0x2fb   :  { %848 = vmatmul.mubr.msk.f32.vlgmr.msra.gmra.mxu1 %vm614_vm0, %v598_v45 }
 0x3bb   :  { %v688_v50 = vpop.f32.mrf.mxu1 }
 0x3bc   :  { %v689_v53 = vadd.f32 %v688_v50, %v580_v49 }
 0x3bd   :  { %v849_v54 = vpop.f32.mrf.mxu1 }
 0x3be   :  { %v696_v55 = vmax.f32 %v689_v53, %v695_v52 }
 0x3c0   :  { %697 = vst [vmem:[%s1103_s9] sm:$0x3] %v696_v55 }

</bundles_post_ra>
